<compile_context>
chip_gen: v5e
topology: v5e:2x2
jax: 0.10.0
libtpu: 0.0.40
codegen_flags: <defaults>
</compile_context>

<pallas_src>
import math

import jax
import jax.numpy as jnp
from jax import lax
from jax.experimental import pallas as pl
from jax.experimental.pallas import tpu as pltpu


def _make_kernel(Cp, P_pad, PW, NB):
    NBP = NB * P_pad
    # tap t = dy*3 + dx  ->  constant lane shift of the flattened padded image
    SHIFTS = [(dy - 1) * PW + (dx - 1) for dy in range(3) for dx in range(3)]

    def kernel(x_ref, w0_ref, b0_ref, w1_ref, b1_ref, mask_ref, o_ref,
               slab_ref, stk_ref):
        # 1) lane-concatenate the NB images into one (Cp, NB*P_pad) relu(x) slab.
        #    b*P_pad is a multiple of 128 -> clean, unmasked, lane-dense copies.
        for b in range(NB):
            slab_ref[:, b * P_pad:(b + 1) * P_pad] = jnp.maximum(x_ref[b], 0.0)

        def conv3x3(w_ref, b_ref, slab):
            # 3x3 taps = XLU lane rotations of the slab (no margins, no unaligned
            # slices).  Stack the 9 taps along K (sublane-aligned stores, Cp % 8 == 0)
            # and do ONE (Cp, 9*Cp) x (9*Cp, NB*P_pad) MXU matmul for all NB images.
            for t, s in enumerate(SHIFTS):
                tap = slab if s == 0 else pltpu.roll(slab, (-s) % NBP, axis=1)
                stk_ref[t * Cp:(t + 1) * Cp, :] = tap
            return (jnp.dot(w_ref[...], stk_ref[...],
                            preferred_element_type=jnp.float32)
                    + b_ref[...])                                # (Cp, NB*P_pad)

        h = conv3x3(w0_ref, b0_ref, slab_ref[...])
        # re-pad the intermediate (zero ring + pixel-pad lanes) and relu, once per step
        r = conv3x3(w1_ref, b1_ref, mask_ref[...] * jnp.maximum(h, 0.0))

        # 2) residual add + scatter back to per-image blocks (384-lane dense stores;
        #    ring / pad lanes carry garbage and are cropped by the wrapper)
        for b in range(NB):
            o_ref[b] = (x_ref[b] + r[:, b * P_pad:(b + 1) * P_pad]).astype(o_ref.dtype)

    return kernel


def cnn_basic_block(x, w0, b0, w1, b1):
    """x: (N, C, H, W) float32 (PyTorch NCHW). Returns (N, C, H, W) float32."""
    # TODO(synk): batch_norm=True branch (nn.BatchNorm2d) not implemented; the
    # module's default batch_norm=False path is what is reproduced here.
    N, C, H, W = x.shape
    PH, PW = H + 2, W + 2
    P = PH * PW
    P_pad = ((P + 127) // 128) * 128              # lane-dense pixel axis (324 -> 384)
    Cp = ((max(C, 8) + 7) // 8) * 8               # channels padded to sublane multiple
    # images per grid step: target 32, but keep >= 2 grid steps whenever N >= 2 so the
    # v7x megacore (2 TensorCores) has parallel work; no-op on v5e/v6e.
    NB = max(1, min(32, (N + 1) // 2))
    Np = ((N + NB - 1) // NB) * NB
    NBP = NB * P_pad

    # NCHW is already (batch, channel, pixel)-major: pad (batch tail / channel pad /
    # spatial ring), flatten pixels, pad the pixel axis to P_pad.  No transposes.
    x_pf = jnp.pad(x.astype(jnp.float32),
                   ((0, Np - N), (0, Cp - C), (1, 1), (1, 1))).reshape(Np, Cp, P)
    x_pf = jnp.pad(x_pf, ((0, 0), (0, 0), (0, P_pad - P)))

    # interior mask (zero on the padding ring AND on pixel-pad lanes), tiled per image
    ii = jnp.arange(PH)[:, None]
    jj = jnp.arange(PW)[None, :]
    interior = (ii >= 1) & (ii <= H) & (jj >= 1) & (jj <= W)
    mask = jnp.pad(interior.astype(jnp.float32).reshape(1, P),
                   ((0, 0), (0, P_pad - P)))
    mask = jnp.tile(mask, (1, NB))                               # (1, NB*P_pad)

    # weights: torch (Cout, Cin, 3, 3) -> fused (Cp, 9*Cp); column = (dy*3+dx)*Cp + ci
    def prep_w(w):
        wk = jnp.transpose(w.astype(jnp.float32), (0, 2, 3, 1))     # (Co, 3, 3, Ci)
        wk = jnp.pad(wk, ((0, Cp - C), (0, 0), (0, 0), (0, Cp - C)))
        return wk.reshape(Cp, 9 * Cp)

    def prep_b(b):
        return jnp.pad(b.astype(jnp.float32), (0, Cp - C)).reshape(Cp, 1)

    w0k, w1k = prep_w(w0), prep_w(w1)
    b0k, b1k = prep_b(b0), prep_b(b1)

    kernel = _make_kernel(Cp, P_pad, PW, NB)
    out_pf = pl.pallas_call(
        kernel,
        out_shape=jax.ShapeDtypeStruct((Np, Cp, P_pad), jnp.float32),
        grid=(Np // NB,),
        in_specs=[
            pl.BlockSpec((NB, Cp, P_pad), lambda n: (n, 0, 0)),   # x  (PF slabs)
            pl.BlockSpec((Cp, 9 * Cp), lambda n: (0, 0)),         # conv0 fused weights
            pl.BlockSpec((Cp, 1), lambda n: (0, 0)),              # conv0 bias
            pl.BlockSpec((Cp, 9 * Cp), lambda n: (0, 0)),         # conv1 fused weights
            pl.BlockSpec((Cp, 1), lambda n: (0, 0)),              # conv1 bias
            pl.BlockSpec((1, NBP), lambda n: (0, 0)),             # interior mask
        ],
        out_specs=pl.BlockSpec((NB, Cp, P_pad), lambda n: (n, 0, 0)),
        scratch_shapes=[pltpu.VMEM((Cp, NBP), jnp.float32),       # relu(x) slab
                        pltpu.VMEM((9 * Cp, NBP), jnp.float32)],  # fused im2col stack
        compiler_params=pltpu.CompilerParams(
            dimension_semantics=("parallel",),
            vmem_limit_bytes=32 * 1024 * 1024),
    )(x_pf, w0k, b0k, w1k, b1k, mask)

    # crop pixel pad / padding ring / channel pad / batch pad; still no transposes.
    out = out_pf[:, :, :P].reshape(Np, Cp, PH, PW)[:N, :C, 1:PH - 1, 1:PW - 1]
    return out


def normed_conv2d_init(key, cin, cout, k=3, scale=1.0):
    """Deterministic stand-in for NormedConv2d init: per-out-channel L2-normalized
    weights scaled by sqrt(scale); bias zeroed (matches `out.bias.data *= 0`)."""
    fan_in = cin * k * k
    bound = 1.0 / math.sqrt(fan_in)
    w = jax.random.uniform(key, (cout, cin, k, k), jnp.float32, -bound, bound)
    norm = jnp.sqrt(jnp.sum(w * w, axis=(1, 2, 3), keepdims=True))
    w = w * (math.sqrt(scale) / norm)
    b = jnp.zeros((cout,), jnp.float32)
    return w, b


def reference(x, w0, b0, w1, b1):
    """Pure-JAX reference replicating the PyTorch forward semantics."""
    def conv(a, w, b):
        y = lax.conv_general_dilated(a, w, (1, 1), ((1, 1), (1, 1)),
                                     dimension_numbers=("NCHW", "OIHW", "NCHW"))
        return y + b.reshape(1, -1, 1, 1)
    h = conv(jax.nn.relu(x), w0, b0)
    r = conv(jax.nn.relu(h), w1, b1)
    return x + r


if __name__ == "__main__":
    key = jax.random.PRNGKey(0)
    kx, k0, k1 = jax.random.split(key, 3)
    N, C, H, W = 2, 4, 16, 16           # inchan = 4 (block preserves channels & shape)

    x = jax.random.normal(kx, (N, C, H, W), jnp.float32)
    w0, b0 = normed_conv2d_init(k0, C, C, scale=1.0)   # CnnBasicBlock(scale=1) -> s=1
    w1, b1 = normed_conv2d_init(k1, C, C, scale=1.0)

    out = jax.jit(cnn_basic_block)(x, w0, b0, w1, b1)
    out = jax.block_until_ready(out)

    ref = reference(x, w0, b0, w1, b1)
    assert out.shape == ref.shape == (N, C, H, W)
    max_err = float(jnp.max(jnp.abs(out - ref)))
    assert jnp.allclose(out, ref, atol=2e-4, rtol=2e-4), f"max abs err {max_err}"
    print("KERNEL_OK")
</pallas_src>

<mosaic_0001>
module attributes {stable_mosaic.version = 11 : i64} {
  func.func @kernel(%arg0: i32, %arg1: memref<1x8x384xf32, #tpu.memory_space<vmem>>, %arg2: memref<8x72xf32, #tpu.memory_space<vmem>>, %arg3: memref<8x1xf32, #tpu.memory_space<vmem>>, %arg4: memref<8x72xf32, #tpu.memory_space<vmem>>, %arg5: memref<8x1xf32, #tpu.memory_space<vmem>>, %arg6: memref<1x384xf32, #tpu.memory_space<vmem>>, %arg7: memref<1x8x384xf32, #tpu.memory_space<vmem>>, %arg8: memref<8x384xf32, #tpu.memory_space<vmem>>, %arg9: memref<72x384xf32, #tpu.memory_space<vmem>>) attributes {dimension_semantics = [#tpu.dimension_semantics<parallel>], iteration_bounds = array<i64: 2>, scalar_prefetch = 0 : i64, scratch_operands = 2 : i64, tpu.core_type = #tpu.core_type<tc>, window_params = [{transform_indices = @transform_0, window_bounds = array<i64: 1, 8, 384>}, {pipeline_mode = #tpu.pipeline_mode<synchronous>, transform_indices = @transform_1, window_bounds = array<i64: 8, 72>}, {pipeline_mode = #tpu.pipeline_mode<synchronous>, transform_indices = @transform_2, window_bounds = array<i64: 8, 1>}, {pipeline_mode = #tpu.pipeline_mode<synchronous>, transform_indices = @transform_3, window_bounds = array<i64: 8, 72>}, {pipeline_mode = #tpu.pipeline_mode<synchronous>, transform_indices = @transform_4, window_bounds = array<i64: 8, 1>}, {pipeline_mode = #tpu.pipeline_mode<synchronous>, transform_indices = @transform_5, window_bounds = array<i64: 1, 384>}, {transform_indices = @transform_6, window_bounds = array<i64: 1, 8, 384>}]} {
    %c0 = arith.constant 0 : index
    %c0_0 = arith.constant 0 : index
    %c0_1 = arith.constant 0 : index
    %0 = vector.load %arg1[%c0, %c0_0, %c0_1] : memref<1x8x384xf32, #tpu.memory_space<vmem>>, vector<1x8x384xf32>
    %1 = vector.shape_cast %0 : vector<1x8x384xf32> to vector<8x384xf32>
    %cst = arith.constant 0.000000e+00 : f32
    %2 = vector.broadcast %cst : f32 to vector<8x384xf32>
    %3 = arith.maximumf %1, %2 : vector<8x384xf32>
    %c0_2 = arith.constant 0 : index
    %c0_3 = arith.constant 0 : index
    %4 = vector.load %arg8[%c0_2, %c0_3] : memref<8x384xf32, #tpu.memory_space<vmem>>, vector<8x384xf32>
    tpu.vector_store %arg8[%c0_2, %c0_3], %3 {strides = array<i32>} : memref<8x384xf32, #tpu.memory_space<vmem>>, vector<8x384xf32>,
    %c0_4 = arith.constant 0 : index
    %c0_5 = arith.constant 0 : index
    %5 = vector.load %arg8[%c0_4, %c0_5] : memref<8x384xf32, #tpu.memory_space<vmem>>, vector<8x384xf32>
    %c19_i32 = arith.constant 19 : i32
    %6 = tpu.dynamic_rotate %5 by %c19_i32 dim 1 : vector<8x384xf32>, i32 -> vector<8x384xf32>
    %c0_6 = arith.constant 0 : index
    %c0_7 = arith.constant 0 : index
    %7 = vector.load %arg9[%c0_6, %c0_7] : memref<72x384xf32, #tpu.memory_space<vmem>>, vector<8x384xf32>
    tpu.vector_store %arg9[%c0_6, %c0_7], %6 {strides = array<i32>} : memref<72x384xf32, #tpu.memory_space<vmem>>, vector<8x384xf32>,
    %c18_i32 = arith.constant 18 : i32
    %8 = tpu.dynamic_rotate %5 by %c18_i32 dim 1 : vector<8x384xf32>, i32 -> vector<8x384xf32>
    %c8 = arith.constant 8 : index
    %c0_8 = arith.constant 0 : index
    %9 = vector.load %arg9[%c8, %c0_8] : memref<72x384xf32, #tpu.memory_space<vmem>>, vector<8x384xf32>
    tpu.vector_store %arg9[%c8, %c0_8], %8 {strides = array<i32>} : memref<72x384xf32, #tpu.memory_space<vmem>>, vector<8x384xf32>,
    %c17_i32 = arith.constant 17 : i32
    %10 = tpu.dynamic_rotate %5 by %c17_i32 dim 1 : vector<8x384xf32>, i32 -> vector<8x384xf32>
    %c16 = arith.constant 16 : index
    %c0_9 = arith.constant 0 : index
    %11 = vector.load %arg9[%c16, %c0_9] : memref<72x384xf32, #tpu.memory_space<vmem>>, vector<8x384xf32>
    tpu.vector_store %arg9[%c16, %c0_9], %10 {strides = array<i32>} : memref<72x384xf32, #tpu.memory_space<vmem>>, vector<8x384xf32>,
    %c1_i32 = arith.constant 1 : i32
    %12 = tpu.dynamic_rotate %5 by %c1_i32 dim 1 : vector<8x384xf32>, i32 -> vector<8x384xf32>
    %c24 = arith.constant 24 : index
    %c0_10 = arith.constant 0 : index
    %13 = vector.load %arg9[%c24, %c0_10] : memref<72x384xf32, #tpu.memory_space<vmem>>, vector<8x384xf32>
    tpu.vector_store %arg9[%c24, %c0_10], %12 {strides = array<i32>} : memref<72x384xf32, #tpu.memory_space<vmem>>, vector<8x384xf32>,
    %c32 = arith.constant 32 : index
    %c0_11 = arith.constant 0 : index
    %14 = vector.load %arg9[%c32, %c0_11] : memref<72x384xf32, #tpu.memory_space<vmem>>, vector<8x384xf32>
    tpu.vector_store %arg9[%c32, %c0_11], %5 {strides = array<i32>} : memref<72x384xf32, #tpu.memory_space<vmem>>, vector<8x384xf32>,
    %c383_i32 = arith.constant 383 : i32
    %15 = tpu.dynamic_rotate %5 by %c383_i32 dim 1 : vector<8x384xf32>, i32 -> vector<8x384xf32>
    %c40 = arith.constant 40 : index
    %c0_12 = arith.constant 0 : index
    %16 = vector.load %arg9[%c40, %c0_12] : memref<72x384xf32, #tpu.memory_space<vmem>>, vector<8x384xf32>
    tpu.vector_store %arg9[%c40, %c0_12], %15 {strides = array<i32>} : memref<72x384xf32, #tpu.memory_space<vmem>>, vector<8x384xf32>,
    %c367_i32 = arith.constant 367 : i32
    %17 = tpu.dynamic_rotate %5 by %c367_i32 dim 1 : vector<8x384xf32>, i32 -> vector<8x384xf32>
    %c48 = arith.constant 48 : index
    %c0_13 = arith.constant 0 : index
    %18 = vector.load %arg9[%c48, %c0_13] : memref<72x384xf32, #tpu.memory_space<vmem>>, vector<8x384xf32>
    tpu.vector_store %arg9[%c48, %c0_13], %17 {strides = array<i32>} : memref<72x384xf32, #tpu.memory_space<vmem>>, vector<8x384xf32>,
    %c366_i32 = arith.constant 366 : i32
    %19 = tpu.dynamic_rotate %5 by %c366_i32 dim 1 : vector<8x384xf32>, i32 -> vector<8x384xf32>
    %c56 = arith.constant 56 : index
    %c0_14 = arith.constant 0 : index
    %20 = vector.load %arg9[%c56, %c0_14] : memref<72x384xf32, #tpu.memory_space<vmem>>, vector<8x384xf32>
    tpu.vector_store %arg9[%c56, %c0_14], %19 {strides = array<i32>} : memref<72x384xf32, #tpu.memory_space<vmem>>, vector<8x384xf32>,
    %c365_i32 = arith.constant 365 : i32
    %21 = tpu.dynamic_rotate %5 by %c365_i32 dim 1 : vector<8x384xf32>, i32 -> vector<8x384xf32>
    %c64 = arith.constant 64 : index
    %c0_15 = arith.constant 0 : index
    %22 = vector.load %arg9[%c64, %c0_15] : memref<72x384xf32, #tpu.memory_space<vmem>>, vector<8x384xf32>
    tpu.vector_store %arg9[%c64, %c0_15], %21 {strides = array<i32>} : memref<72x384xf32, #tpu.memory_space<vmem>>, vector<8x384xf32>,
    %c0_16 = arith.constant 0 : index
    %c0_17 = arith.constant 0 : index
    %23 = vector.load %arg2[%c0_16, %c0_17] : memref<8x72xf32, #tpu.memory_space<vmem>>, vector<8x72xf32>
    %c0_18 = arith.constant 0 : index
    %c0_19 = arith.constant 0 : index
    %24 = vector.load %arg9[%c0_18, %c0_19] : memref<72x384xf32, #tpu.memory_space<vmem>>, vector<72x384xf32>
    %cst_20 = arith.constant dense<0.000000e+00> : vector<8x384xf32>
    %25 = tpu.matmul %23, %24, %cst_20 {dimension_numbers = #tpu.dot_dimension_numbers<[1], [0], [0], [1], [0, 0, 1, 1], [], []>} : vector<8x72xf32>, vector<72x384xf32>, vector<8x384xf32> -> vector<8x384xf32>
    %c0_21 = arith.constant 0 : index
    %c0_22 = arith.constant 0 : index
    %26 = vector.load %arg3[%c0_21, %c0_22] : memref<8x1xf32, #tpu.memory_space<vmem>>, vector<8x1xf32>
    %27 = vector.broadcast %26 : vector<8x1xf32> to vector<8x384xf32>
    %28 = arith.addf %25, %27 : vector<8x384xf32>
    %c0_23 = arith.constant 0 : index
    %c0_24 = arith.constant 0 : index
    %29 = vector.load %arg6[%c0_23, %c0_24] : memref<1x384xf32, #tpu.memory_space<vmem>>, vector<1x384xf32>
    %cst_25 = arith.constant 0.000000e+00 : f32
    %30 = vector.broadcast %cst_25 : f32 to vector<8x384xf32>
    %31 = arith.maximumf %28, %30 : vector<8x384xf32>
    %32 = vector.broadcast %29 : vector<1x384xf32> to vector<8x384xf32>
    %33 = arith.mulf %32, %31 : vector<8x384xf32>
    %c19_i32_26 = arith.constant 19 : i32
    %34 = tpu.dynamic_rotate %33 by %c19_i32_26 dim 1 : vector<8x384xf32>, i32 -> vector<8x384xf32>
    %c0_27 = arith.constant 0 : index
    %c0_28 = arith.constant 0 : index
    %35 = vector.load %arg9[%c0_27, %c0_28] : memref<72x384xf32, #tpu.memory_space<vmem>>, vector<8x384xf32>
    tpu.vector_store %arg9[%c0_27, %c0_28], %34 {strides = array<i32>} : memref<72x384xf32, #tpu.memory_space<vmem>>, vector<8x384xf32>,
    %c18_i32_29 = arith.constant 18 : i32
    %36 = tpu.dynamic_rotate %33 by %c18_i32_29 dim 1 : vector<8x384xf32>, i32 -> vector<8x384xf32>
    %c8_30 = arith.constant 8 : index
    %c0_31 = arith.constant 0 : index
    %37 = vector.load %arg9[%c8_30, %c0_31] : memref<72x384xf32, #tpu.memory_space<vmem>>, vector<8x384xf32>
    tpu.vector_store %arg9[%c8_30, %c0_31], %36 {strides = array<i32>} : memref<72x384xf32, #tpu.memory_space<vmem>>, vector<8x384xf32>,
    %c17_i32_32 = arith.constant 17 : i32
    %38 = tpu.dynamic_rotate %33 by %c17_i32_32 dim 1 : vector<8x384xf32>, i32 -> vector<8x384xf32>
    %c16_33 = arith.constant 16 : index
    %c0_34 = arith.constant 0 : index
    %39 = vector.load %arg9[%c16_33, %c0_34] : memref<72x384xf32, #tpu.memory_space<vmem>>, vector<8x384xf32>
    tpu.vector_store %arg9[%c16_33, %c0_34], %38 {strides = array<i32>} : memref<72x384xf32, #tpu.memory_space<vmem>>, vector<8x384xf32>,
    %c1_i32_35 = arith.constant 1 : i32
    %40 = tpu.dynamic_rotate %33 by %c1_i32_35 dim 1 : vector<8x384xf32>, i32 -> vector<8x384xf32>
    %c24_36 = arith.constant 24 : index
    %c0_37 = arith.constant 0 : index
    %41 = vector.load %arg9[%c24_36, %c0_37] : memref<72x384xf32, #tpu.memory_space<vmem>>, vector<8x384xf32>
    tpu.vector_store %arg9[%c24_36, %c0_37], %40 {strides = array<i32>} : memref<72x384xf32, #tpu.memory_space<vmem>>, vector<8x384xf32>,
    %c32_38 = arith.constant 32 : index
    %c0_39 = arith.constant 0 : index
    %42 = vector.load %arg9[%c32_38, %c0_39] : memref<72x384xf32, #tpu.memory_space<vmem>>, vector<8x384xf32>
    tpu.vector_store %arg9[%c32_38, %c0_39], %33 {strides = array<i32>} : memref<72x384xf32, #tpu.memory_space<vmem>>, vector<8x384xf32>,
    %c383_i32_40 = arith.constant 383 : i32
    %43 = tpu.dynamic_rotate %33 by %c383_i32_40 dim 1 : vector<8x384xf32>, i32 -> vector<8x384xf32>
    %c40_41 = arith.constant 40 : index
    %c0_42 = arith.constant 0 : index
    %44 = vector.load %arg9[%c40_41, %c0_42] : memref<72x384xf32, #tpu.memory_space<vmem>>, vector<8x384xf32>
    tpu.vector_store %arg9[%c40_41, %c0_42], %43 {strides = array<i32>} : memref<72x384xf32, #tpu.memory_space<vmem>>, vector<8x384xf32>,
    %c367_i32_43 = arith.constant 367 : i32
    %45 = tpu.dynamic_rotate %33 by %c367_i32_43 dim 1 : vector<8x384xf32>, i32 -> vector<8x384xf32>
    %c48_44 = arith.constant 48 : index
    %c0_45 = arith.constant 0 : index
    %46 = vector.load %arg9[%c48_44, %c0_45] : memref<72x384xf32, #tpu.memory_space<vmem>>, vector<8x384xf32>
    tpu.vector_store %arg9[%c48_44, %c0_45], %45 {strides = array<i32>} : memref<72x384xf32, #tpu.memory_space<vmem>>, vector<8x384xf32>,
    %c366_i32_46 = arith.constant 366 : i32
    %47 = tpu.dynamic_rotate %33 by %c366_i32_46 dim 1 : vector<8x384xf32>, i32 -> vector<8x384xf32>
    %c56_47 = arith.constant 56 : index
    %c0_48 = arith.constant 0 : index
    %48 = vector.load %arg9[%c56_47, %c0_48] : memref<72x384xf32, #tpu.memory_space<vmem>>, vector<8x384xf32>
    tpu.vector_store %arg9[%c56_47, %c0_48], %47 {strides = array<i32>} : memref<72x384xf32, #tpu.memory_space<vmem>>, vector<8x384xf32>,
    %c365_i32_49 = arith.constant 365 : i32
    %49 = tpu.dynamic_rotate %33 by %c365_i32_49 dim 1 : vector<8x384xf32>, i32 -> vector<8x384xf32>
    %c64_50 = arith.constant 64 : index
    %c0_51 = arith.constant 0 : index
    %50 = vector.load %arg9[%c64_50, %c0_51] : memref<72x384xf32, #tpu.memory_space<vmem>>, vector<8x384xf32>
    tpu.vector_store %arg9[%c64_50, %c0_51], %49 {strides = array<i32>} : memref<72x384xf32, #tpu.memory_space<vmem>>, vector<8x384xf32>,
    %c0_52 = arith.constant 0 : index
    %c0_53 = arith.constant 0 : index
    %51 = vector.load %arg4[%c0_52, %c0_53] : memref<8x72xf32, #tpu.memory_space<vmem>>, vector<8x72xf32>
    %c0_54 = arith.constant 0 : index
    %c0_55 = arith.constant 0 : index
    %52 = vector.load %arg9[%c0_54, %c0_55] : memref<72x384xf32, #tpu.memory_space<vmem>>, vector<72x384xf32>
    %cst_56 = arith.constant dense<0.000000e+00> : vector<8x384xf32>
    %53 = tpu.matmul %51, %52, %cst_56 {dimension_numbers = #tpu.dot_dimension_numbers<[1], [0], [0], [1], [0, 0, 1, 1], [], []>} : vector<8x72xf32>, vector<72x384xf32>, vector<8x384xf32> -> vector<8x384xf32>
    %c0_57 = arith.constant 0 : index
    %c0_58 = arith.constant 0 : index
    %54 = vector.load %arg5[%c0_57, %c0_58] : memref<8x1xf32, #tpu.memory_space<vmem>>, vector<8x1xf32>
    %55 = vector.broadcast %54 : vector<8x1xf32> to vector<8x384xf32>
    %56 = arith.addf %53, %55 : vector<8x384xf32>
    %c0_59 = arith.constant 0 : index
    %c0_60 = arith.constant 0 : index
    %c0_61 = arith.constant 0 : index
    %57 = vector.load %arg1[%c0_59, %c0_60, %c0_61] : memref<1x8x384xf32, #tpu.memory_space<vmem>>, vector<1x8x384xf32>
    %58 = vector.shape_cast %57 : vector<1x8x384xf32> to vector<8x384xf32>
    %59 = arith.addf %58, %56 : vector<8x384xf32>
    %c0_62 = arith.constant 0 : index
    %c0_63 = arith.constant 0 : index
    %c0_64 = arith.constant 0 : index
    %60 = vector.load %arg7[%c0_62, %c0_63, %c0_64] : memref<1x8x384xf32, #tpu.memory_space<vmem>>, vector<1x8x384xf32>
    %61 = vector.shape_cast %60 : vector<1x8x384xf32> to vector<8x384xf32>
    %62 = vector.shape_cast %59 : vector<8x384xf32> to vector<1x8x384xf32>
    tpu.vector_store %arg7[%c0_62, %c0_63, %c0_64], %62 {strides = array<i32>} : memref<1x8x384xf32, #tpu.memory_space<vmem>>, vector<1x8x384xf32>,
    return
  }
  func.func @transform_0(%arg0: i32) -> (i32, i32, i32) {
    %c0_i32 = arith.constant 0 : i32
    %c0_i32_0 = arith.constant 0 : i32
    %c0_i32_1 = arith.constant 0 : i32
    return %arg0, %c0_i32, %c0_i32_0 : i32, i32, i32
  }
  func.func @transform_1(%arg0: i32) -> (i32, i32) {
    %c0_i32 = arith.constant 0 : i32
    %c0_i32_0 = arith.constant 0 : i32
    %c0_i32_1 = arith.constant 0 : i32
    return %c0_i32, %c0_i32_0 : i32, i32
  }
  func.func @transform_2(%arg0: i32) -> (i32, i32) {
    %c0_i32 = arith.constant 0 : i32
    %c0_i32_0 = arith.constant 0 : i32
    %c0_i32_1 = arith.constant 0 : i32
    return %c0_i32, %c0_i32_0 : i32, i32
  }
  func.func @transform_3(%arg0: i32) -> (i32, i32) {
    %c0_i32 = arith.constant 0 : i32
    %c0_i32_0 = arith.constant 0 : i32
    %c0_i32_1 = arith.constant 0 : i32
    return %c0_i32, %c0_i32_0 : i32, i32
  }
  func.func @transform_4(%arg0: i32) -> (i32, i32) {
    %c0_i32 = arith.constant 0 : i32
    %c0_i32_0 = arith.constant 0 : i32
    %c0_i32_1 = arith.constant 0 : i32
    return %c0_i32, %c0_i32_0 : i32, i32
  }
  func.func @transform_5(%arg0: i32) -> (i32, i32) {
    %c0_i32 = arith.constant 0 : i32
    %c0_i32_0 = arith.constant 0 : i32
    %c0_i32_1 = arith.constant 0 : i32
    return %c0_i32, %c0_i32_0 : i32, i32
  }
  func.func @transform_6(%arg0: i32) -> (i32, i32, i32) {
    %c0_i32 = arith.constant 0 : i32
    %c0_i32_0 = arith.constant 0 : i32
    %c0_i32_1 = arith.constant 0 : i32
    return %arg0, %c0_i32, %c0_i32_0 : i32, i32, i32
  }
}

</mosaic_0001>

<bundles_post_ra>
// kernel: cnn_basic_block.1
= control target key start
LH: loop header
LB: loop body
LE: loop exit
PB: predicated region body
PF: predicated region fallthrough
CT: control target
= control target key end

     0   :  { %s912_s21 = smov 0   ;;  %s1142_s0 = inlined_call_operand.vmem [shape: f32[2,8,384], index: 0, kind: input, shape index: {}]   ;;  %s1143_s1 = inlined_call_operand.vmem [shape: f32[8,72], index: 1, kind: input, shape index: {}]   ;;  %s1144_s2 = inlined_call_operand.vmem [shape: f32[8,1], index: 2, kind: input, shape index: {}]   ;;  %s1145_s3 = inlined_call_operand.vmem [shape: f32[8,72], index: 3, kind: input, shape index: {}]   ;;  %s1146_s4 = inlined_call_operand.vmem [shape: f32[8,1], index: 4, kind: input, shape index: {}]   ;;  %s1147_s5 = inlined_call_operand.vmem [shape: f32[1,384], index: 5, kind: input, shape index: {}]   ;;  %s1148_s6 = inlined_call_operand.vmem [shape: f32[2,8,384], index: 6, kind: output, shape index: {}]  }
   0x1 LB: > { %s745_s22 = sadd.s32 4294967295, %s866_s21   ;;  %p749_p0 = scmp.ge.s32.totalorder %s866_s21, 1  ;;  %s866_s21 = sphi %s912_s21, %s16_s21  }
   0x2   : > { %p212_p1 = scmp.lt.s32.totalorder %s866_s21, 3 }
   0x4   : > { %p213_p2 = pnand %p749_p0, %p212_p1 }
   0x5   : > { %p242_p3 = scmp.lt.s32.totalorder (!%p213_p2), %s745_s22, 1  ;;  %s868_s27 = smov (!%p213_p2), 110  }
   0x6   : > { %216 = sbr.rel (%p213_p2) target bundleno = 596 (0x254), region = 44  ;;  %s869_s28 = smov (!%p213_p2), 109  }
   0x7   : > { %s870_s29 = smov (!%p213_p2), 111   ;;  %s871_s30 = smov (!%p213_p2), 127  }
   0x8   : > { %s872_s7 = smov (!%p213_p2), 1   ;;  %s873_s8 = smov (!%p213_p2), 17  }
   0x9   : > { %s874_s9 = smov (!%p213_p2), 18   ;;  %s875_s10 = smov (!%p213_p2), 19  }
   0xb   : > { %s1150_s22 = smov (!%p242_p3, %s745_s22), 1  ;;  %v270_v8 = vlaneseq  ;;  %v401_v29 = vld [vmem:[%s1144_s2] sm:$0xff]  ;;  %v876_v32 = vmov 0   ;;  %vm407_vm8 = vcmask 588800  }
   0xc   : > { %s760_s23 = smul.u32 24, %s1150_s22  ;;  %818 = vset.pattern.permute.xlu1 %v876_v32  ;;  %859 = vset.pattern.permute.xlu0 %v876_v32 }
   0xd   : > { %v967_v9 = vand.u32 127, %v270_v8  ;;  %v471_v8 = vld [vmem:[%s1147_s5] sm:$0x7] }
   0xe   : > { %s246_s26 = scalar_lea.vmem %s1142_s0, %s760_s23 }
   0xf   : > { %v928_v0 = vld [vmem:[%s246_s26] sm:$0xff]  ;;  %v930_v1 = vld [vmem:[%s246_s26 + $0x8] sm:$0xff]  ;;  %v940_v5 = vld [vmem:[%s246_s26 + $0x10] sm:$0xff]  ;;  %vm366_vm0 = vcmp.lt.s32.totalorder %v967_v9, 109  ;;  %vm353_vm1 = vcmp.lt.s32.totalorder %v967_v9, 110  ;;  %vm340_vm2 = vcmp.lt.s32.totalorder %v967_v9, 111  ;;  %s251_s26 = scalar_lea.vmem %s1148_s6, %s760_s23 }
  0x10   : > { %v255_v2 = vmax.f32 %v928_v0, 0.0  ;;  %v256_v3 = vmax.f32 %v930_v1, 0.0  ;;  %v944_v6 = vmax.f32 %v940_v5, 0.0  ;;  %vm327_vm3 = vcmp.lt.s32.totalorder %v967_v9, 127 }
  0x11   : > { %vm311_vm4 = vcmp.lt.s32.totalorder %v967_v9, 1  ;;  %vm298_vm5 = vcmp.lt.s32.totalorder %v967_v9, 17  ;;  %vm285_vm6 = vcmp.lt.s32.totalorder %v967_v9, 18  ;;  %vm272_vm7 = vcmp.lt.s32.totalorder %v967_v9, 19 }
  0x12   : > { %v783_v4 = vpack.i.bf16 %v256_v3, %v255_v2 }
  0x14   : > { %784 = vrot.lane.b32.xlu1 %v783_v4, %s868_s27  ;;  %779 = vrot.lane.b32.xlu0 %v783_v4, %s869_s28 }
  0x15   : > { %789 = vrot.lane.b32.xlu2 %v783_v4, %s870_s29 }
  0x1c   : > { %351 = vrot.lane.b32.xlu1 %v944_v6, %s868_s27  ;;  %364 = vrot.lane.b32.xlu0 %v944_v6, %s869_s28 }
  0x1d   : > { %338 = vrot.lane.b32.xlu2 %v944_v6, %s870_s29 }
  0x24   : > { %794 = vrot.lane.b32.xlu0 %v783_v4, %s871_s30  ;;  %325 = vrot.lane.b32.xlu1 %v944_v6, %s871_s30 }
  0x25   : > { %799 = vrot.lane.b32.xlu2 %v783_v4, %s872_s7 }
  0x2c   : > { %309 = vrot.lane.b32.xlu0 %v944_v6, %s872_s7  ;;  %804 = vrot.lane.b32.xlu1 %v783_v4, %s873_s8 }
  0x2d   : > { %296 = vrot.lane.b32.xlu2 %v944_v6, %s873_s8 }
  0x34   : > { %809 = vrot.lane.b32.xlu0 %v783_v4, %s874_s9  ;;  %283 = vrot.lane.b32.xlu1 %v944_v6, %s874_s9 }
  0x35   : > { %814 = vrot.lane.b32.xlu2 %v783_v4, %s875_s10 }
  0x3c   : > { %268 = vrot.lane.b32.xlu0 %v944_v6, %s875_s10  ;;  %404 = vperm.xlu1 %818, %v401_v29  }
  0x6f   : > { %v790_v7 = vpop.permute.xlu2 %789 }
  0x70   : > { %v792_v11 = vunpack.i.h.bf16 %v790_v7  ;;  %v791_v12 = vunpack.i.l.bf16 %v790_v7 }
  0x72   : > { %v342_v21 = vsel %vm340_vm2, %v791_v12, %v792_v11 }
  0x77   : > { %v339_v10 = vpop.permute.xlu2 %338 }
  0x78   : > { %v341_v30 = vsel %vm340_vm2, %v792_v11, %v339_v10  ;;  %v343_v31 = vsel %vm340_vm2, %v339_v10, %v791_v12 }
  0x7f   : > { %v800_v22 = vpop.permute.xlu2 %799 }
  0x80   : > { %v802_v37 = vunpack.i.h.bf16 %v800_v22  ;;  %v801_v38 = vunpack.i.l.bf16 %v800_v22 }
  0x82   : > { %v313_v43 = vsel %vm311_vm4, %v801_v38, %v802_v37 }
  0x86   : > { %v785_v13 = vpop.permute.xlu1 %784  ;;  %v780_v14 = vpop.permute.xlu0 %779 }
  0x87   : > { %v787_v15 = vunpack.i.h.bf16 %v785_v13  ;;  %v786_v16 = vunpack.i.l.bf16 %v785_v13  ;;  %v782_v17 = vunpack.i.h.bf16 %v780_v14  ;;  %v781_v18 = vunpack.i.l.bf16 %v780_v14  ;;  %v297_v39 = vpop.permute.xlu2 %296 }
  0x88   : > { %v477_v13 = vperm.slane %v471_v8, 1 }
  0x89   : > { %v368_v19 = vsel %vm366_vm0, %v781_v18, %v782_v17  ;;  %v355_v20 = vsel %vm353_vm1, %v786_v16, %v787_v15 }
  0x8a   : > { %418 = vmatpush.msra.mxu0 %v368_v19 }
  0x8c   : > { %419 = vmatpush.msra.mxu0 %v355_v20 }
  0x8e   : > { %v352_v23 = vpop.permute.xlu1 %351  ;;  %v365_v24 = vpop.permute.xlu0 %364  ;;  %420 = vmatpush.msra.mxu0 %v342_v21 }
  0x8f   : > { %v367_v25 = vsel %vm366_vm0, %v782_v17, %v365_v24  ;;  %v369_v26 = vsel %vm366_vm0, %v365_v24, %v781_v18  ;;  %v354_v27 = vsel %vm353_vm1, %v787_v15, %v352_v23  ;;  %v356_v28 = vsel %vm353_vm1, %v352_v23, %v786_v16  ;;  %v815_v53 = vpop.permute.xlu2 %814 }
  0x90   : > { %438 = vmatpush.msra.mxu1 %v367_v25  ;;  %458 = vmatpush.msra.mxu2 %v369_v26  ;;  %v817_v54 = vunpack.i.h.bf16 %v815_v53  ;;  %v816_v55 = vunpack.i.l.bf16 %v815_v53  ;;  %v476_v16 = vperm.slane %v471_v8, 0  ;;  %v478_v24 = vperm.slane %v471_v8, 2 }
  0x92   : > { %439 = vmatpush.msra.mxu1 %v354_v27  ;;  %459 = vmatpush.msra.mxu2 %v356_v28  ;;  %v274_v63 = vsel %vm272_vm7, %v816_v55, %v817_v54 }
  0x94   : > { %440 = vmatpush.msra.mxu1 %v341_v30  ;;  %460 = vmatpush.msra.mxu2 %v343_v31 }
  0x96   : > { %v795_v33 = vpop.permute.xlu0 %794  ;;  %v326_v34 = vpop.permute.xlu1 %325 }
  0x97   : > { %v797_v35 = vunpack.i.h.bf16 %v795_v33  ;;  %v796_v36 = vunpack.i.l.bf16 %v795_v33 }
  0x99   : > { %v329_v40 = vsel %vm327_vm3, %v796_v36, %v797_v35  ;;  %v328_v41 = vsel %vm327_vm3, %v797_v35, %v326_v34  ;;  %v330_v42 = vsel %vm327_vm3, %v326_v34, %v796_v36 }
  0x9a   : > { %421 = vmatpush.msra.mxu0 %v329_v40  ;;  %441 = vmatpush.msra.mxu1 %v328_v41 }
  0x9b   : > { %461 = vmatpush.msra.mxu2 %v330_v42 }
  0x9c   : > { %422 = vmatpush.msra.mxu0 %v255_v2  ;;  %442 = vmatpush.msra.mxu1 %v256_v3  ;;  %v373_v2 = vld [vmem:[%s1143_s1] sm:$0xff] }
  0x9d   : > { %462 = vmatpush.msra.mxu2 %v944_v6 }
  0x9e   : > { %v310_v44 = vpop.permute.xlu0 %309  ;;  %v805_v45 = vpop.permute.xlu1 %804  ;;  %443 = vmatpush.msra.mxu1 %v313_v43 }
  0x9f   : > { %v807_v46 = vunpack.i.h.bf16 %v805_v45  ;;  %v806_v47 = vunpack.i.l.bf16 %v805_v45  ;;  %v314_v48 = vsel %vm311_vm4, %v310_v44, %v801_v38  ;;  %v312_v49 = vsel %vm311_vm4, %v802_v37, %v310_v44 }
  0xa0   : > { %423 = vmatpush.msra.mxu0 %v314_v48  ;;  %463 = vmatpush.msra.mxu2 %v312_v49 }
  0xa1   : > { %v301_v50 = vsel %vm298_vm5, %v297_v39, %v806_v47  ;;  %v299_v51 = vsel %vm298_vm5, %v807_v46, %v297_v39  ;;  %v300_v52 = vsel %vm298_vm5, %v806_v47, %v807_v46  ;;  %v612_v46 = vld [vmem:[%s1146_s4] sm:$0xff] }
  0xa2   : > { %424 = vmatpush.msra.mxu0 %v301_v50  ;;  %464 = vmatpush.msra.mxu2 %v299_v51 }
  0xa3   : > { %444 = vmatpush.msra.mxu1 %v300_v52 }
  0xa6   : > { %v810_v56 = vpop.permute.xlu0 %809  ;;  %v284_v57 = vpop.permute.xlu1 %283 }
  0xa7   : > { %v812_v58 = vunpack.i.h.bf16 %v810_v56  ;;  %v811_v59 = vunpack.i.l.bf16 %v810_v56 }
  0xa9   : > { %v288_v60 = vsel %vm285_vm6, %v284_v57, %v811_v59  ;;  %v287_v61 = vsel %vm285_vm6, %v811_v59, %v812_v58  ;;  %v286_v62 = vsel %vm285_vm6, %v812_v58, %v284_v57 }
  0xaa   : > { %425 = vmatpush.msra.mxu0 %v288_v60  ;;  %445 = vmatpush.msra.mxu1 %v287_v61 }
  0xab   : > { %465 = vmatpush.msra.mxu2 %v286_v62 }
  0xac   : > { %446 = vmatpush.msra.mxu1 %v274_v63 }
  0xad   : > { %753 = vmatmul.msk.f32.vlgmr.msra.gmra.mxu1 %vm407_vm8, %v373_v2 }
  0xae   : > { %v269_v3 = vpop.permute.xlu0 %268  ;;  %v405_v7 = vpop.permute.xlu1 %404 }
  0xaf   : > { %v275_v4 = vsel %vm272_vm7, %v269_v3, %v816_v55  ;;  %v273_v6 = vsel %vm272_vm7, %v817_v54, %v269_v3 }
  0xb0   : > { %426 = vmatpush.msra.mxu0 %v275_v4  ;;  %466 = vmatpush.msra.mxu2 %v273_v6 }
  0xb1   : > { %752 = vmatmul.msk.f32.vlgmr.msra.gmra.mxu0 %vm407_vm8, %v373_v2  ;;  %754 = vmatmul.msk.f32.vlgmr.msra.gmra.mxu2 %vm407_vm8, %v373_v2 }
 0x12a   : > { %v448_v10 = vpop.f32.mrf.mxu1 }
 0x12b   : > { %v449_v11 = vadd.f32 %v448_v10, %v405_v7 }
 0x12d   : > { %v473_v12 = vmax.f32 %v449_v11, 0.0 }
 0x12e   : > { %v428_v14 = vpop.f32.mrf.mxu0 }
 0x12f   : > { %v429_v15 = vadd.f32 %v428_v14, %v405_v7  ;;  %v1042_v18 = vmul.f32 %v477_v13, %v473_v12  ;;  %v584_v14 = vld [vmem:[%s1145_s3] sm:$0xff] }
 0x131   : > { %v472_v17 = vmax.f32 %v429_v15, 0.0 }
 0x133   : > { %v482_v19 = vmul.f32 %v476_v16, %v472_v17 }
 0x134   : > { %v468_v20 = vpop.f32.mrf.mxu2 }
 0x135   : > { %v469_v21 = vadd.f32 %v468_v20, %v405_v7  ;;  %v829_v22 = vpack.i.bf16 %v1042_v18, %v482_v19 }
 0x137   : > { %830 = vrot.lane.b32.xlu1 %v829_v22, %s870_s29  ;;  %825 = vrot.lane.b32.xlu0 %v829_v22, %s868_s27  ;;  %v474_v23 = vmax.f32 %v469_v21, 0.0 }
 0x138   : > { %820 = vrot.lane.b32.xlu2 %v829_v22, %s869_s28 }
 0x139   : > { %v1048_v25 = vmul.f32 %v478_v24, %v474_v23 }
 0x13b   : > { %v844_v26 = vpack.i.bf16 %v1048_v25, %v482_v19 }
 0x13f   : > { %564 = vrot.lane.b32.xlu1 %v1048_v25, %s868_s27  ;;  %576 = vrot.lane.b32.xlu0 %v1048_v25, %s869_s28 }
 0x140   : > { %835 = vrot.lane.b32.xlu2 %v829_v22, %s871_s30 }
 0x147   : > { %845 = vrot.lane.b32.xlu1 %v844_v26, %s873_s8  ;;  %552 = vrot.lane.b32.xlu0 %v1048_v25, %s870_s29 }
 0x148   : > { %840 = vrot.lane.b32.xlu2 %v844_v26, %s872_s7 }
 0x14f   : > { %855 = vrot.lane.b32.xlu1 %v844_v26, %s875_s10  ;;  %850 = vrot.lane.b32.xlu0 %v844_v26, %s874_s9 }
 0x150   : > { %540 = vrot.lane.b32.xlu2 %v1048_v25, %s871_s30 }
 0x157   : > { %499 = vrot.lane.b32.xlu1 %v1042_v18, %s874_s9  ;;  %511 = vrot.lane.b32.xlu0 %v1042_v18, %s873_s8 }
 0x158   : > { %523 = vrot.lane.b32.xlu2 %v1042_v18, %s872_s7 }
 0x15f   : > { %615 = vperm.xlu0 %859, %v612_v46  }
 0x160   : > { %487 = vrot.lane.b32.xlu2 %v1042_v18, %s875_s10 }
 0x192   : > { %v821_v27 = vpop.permute.xlu2 %820 }
 0x193   : > { %v823_v28 = vunpack.i.h.bf16 %v821_v27  ;;  %v822_v29 = vunpack.i.l.bf16 %v821_v27 }
 0x195   : > { %v579_v30 = vsel %vm366_vm0, %v822_v29, %v823_v28 }
 0x196   : > { %628 = vmatpush.msra.mxu3 %v579_v30 }
 0x19a   : > { %v836_v31 = vpop.permute.xlu2 %835 }
 0x19b   : > { %v838_v39 = vunpack.i.h.bf16 %v836_v31  ;;  %v837_v40 = vunpack.i.l.bf16 %v836_v31 }
 0x19d   : > { %v543_v45 = vsel %vm327_vm3, %v837_v40, %v838_v39 }
 0x1a2   : > { %v841_v32 = vpop.permute.xlu2 %840 }
 0x1a3   : > { %v843_v43 = vunpack.i.h.bf16 %v841_v32  ;;  %v842_v44 = vunpack.i.l.bf16 %v841_v32 }
 0x1a5   : > { %v529_v52 = vsel %vm311_vm4, %v843_v43, %v842_v44 }
 0x1a9   : > { %v831_v33 = vpop.permute.xlu1 %830  ;;  %v826_v34 = vpop.permute.xlu0 %825 }
 0x1aa   : > { %v833_v35 = vunpack.i.h.bf16 %v831_v33  ;;  %v832_v36 = vunpack.i.l.bf16 %v831_v33  ;;  %v828_v37 = vunpack.i.h.bf16 %v826_v34  ;;  %v827_v38 = vunpack.i.l.bf16 %v826_v34  ;;  %v541_v51 = vpop.permute.xlu2 %540 }
 0x1ab   : > { %v542_v62 = vsel %vm327_vm3, %v838_v39, %v541_v51  ;;  %v544_v2 = vsel %vm327_vm3, %v541_v51, %v837_v40 }
 0x1ac   : > { %v567_v41 = vsel %vm353_vm1, %v827_v38, %v828_v37  ;;  %v555_v42 = vsel %vm340_vm2, %v832_v36, %v833_v35 }
 0x1ad   : > { %629 = vmatpush.msra.mxu3 %v567_v41 }
 0x1af   : > { %630 = vmatpush.msra.mxu3 %v555_v42 }
 0x1b1   : > { %v565_v47 = vpop.permute.xlu1 %564  ;;  %v577_v48 = vpop.permute.xlu0 %576  ;;  %631 = vmatpush.msra.mxu3 %v543_v45 }
 0x1b2   : > { %v578_v49 = vsel %vm366_vm0, %v823_v28, %v577_v48  ;;  %v580_v50 = vsel %vm366_vm0, %v577_v48, %v822_v29  ;;  %v566_v53 = vsel %vm353_vm1, %v828_v37, %v565_v47  ;;  %v568_v54 = vsel %vm353_vm1, %v565_v47, %v827_v38  ;;  %v524_v63 = vpop.permute.xlu2 %523 }
 0x1b3   : > { %632 = vmatpush.msra.mxu3 %v482_v19  ;;  %648 = vmatpush.msrb.mxu0 %v578_v49  ;;  %v528_v3 = vsel %vm311_vm4, %v842_v44, %v524_v63  ;;  %v527_v7 = vsel %vm311_vm4, %v524_v63, %v843_v43 }
 0x1b4   : > { %668 = vmatpush.msrb.mxu1 %v580_v50 }
 0x1b5   : > { %633 = vmatpush.msra.mxu3 %v529_v52  ;;  %649 = vmatpush.msrb.mxu0 %v566_v53 }
 0x1b6   : > { %669 = vmatpush.msrb.mxu1 %v568_v54 }
 0x1b9   : > { %v846_v55 = vpop.permute.xlu1 %845  ;;  %v553_v56 = vpop.permute.xlu0 %552 }
 0x1ba   : > { %v848_v57 = vunpack.i.h.bf16 %v846_v55  ;;  %v847_v58 = vunpack.i.l.bf16 %v846_v55  ;;  %v554_v59 = vsel %vm340_vm2, %v833_v35, %v553_v56  ;;  %v556_v60 = vsel %vm340_vm2, %v553_v56, %v832_v36  ;;  %v488_v22 = vpop.permute.xlu2 %487 }
 0x1bb   : > { %650 = vmatpush.msrb.mxu0 %v554_v59  ;;  %670 = vmatpush.msrb.mxu1 %v556_v60 }
 0x1bc   : > { %v517_v61 = vsel %vm298_vm5, %v848_v57, %v847_v58 }
 0x1bd   : > { %634 = vmatpush.msra.mxu3 %v517_v61  ;;  %651 = vmatpush.msrb.mxu0 %v542_v62 }
 0x1be   : > { %671 = vmatpush.msrb.mxu1 %v544_v2 }
 0x1bf   : > { %652 = vmatpush.msrb.mxu0 %v1042_v18 }
 0x1c0   : > { %672 = vmatpush.msrb.mxu1 %v1048_v25 }
 0x1c1   : > { %v856_v4 = vpop.permute.xlu1 %855  ;;  %v851_v6 = vpop.permute.xlu0 %850  ;;  %653 = vmatpush.msrb.mxu0 %v528_v3 }
 0x1c2   : > { %v858_v8 = vunpack.i.h.bf16 %v856_v4  ;;  %v857_v10 = vunpack.i.l.bf16 %v856_v4  ;;  %v853_v11 = vunpack.i.h.bf16 %v851_v6  ;;  %v852_v12 = vunpack.i.l.bf16 %v851_v6  ;;  %673 = vmatpush.msrb.mxu1 %v527_v7 }
 0x1c4   : > { %v505_v13 = vsel %vm285_vm6, %v853_v11, %v852_v12  ;;  %v493_v15 = vsel %vm272_vm7, %v858_v8, %v857_v10  ;;  %v492_v23 = vsel %vm272_vm7, %v857_v10, %v488_v22  ;;  %v491_v24 = vsel %vm272_vm7, %v488_v22, %v858_v8 }
 0x1c5   : > { %635 = vmatpush.msra.mxu3 %v505_v13 }
 0x1c7   : > { %636 = vmatpush.msra.mxu3 %v493_v15 }
 0x1c8   : > { %755 = vmatmul.msk.f32.vlgmr.msra.gmra.mxu3 %vm407_vm8, %v584_v14 }
 0x1c9   : > { %v500_v16 = vpop.permute.xlu1 %499  ;;  %v512_v17 = vpop.permute.xlu0 %511 }
 0x1ca   : > { %v516_v18 = vsel %vm298_vm5, %v847_v58, %v512_v17  ;;  %v515_v19 = vsel %vm298_vm5, %v512_v17, %v848_v57  ;;  %v504_v20 = vsel %vm285_vm6, %v852_v12, %v500_v16  ;;  %v503_v21 = vsel %vm285_vm6, %v500_v16, %v853_v11 }
 0x1cb   : > { %654 = vmatpush.msrb.mxu0 %v516_v18  ;;  %674 = vmatpush.msrb.mxu1 %v515_v19 }
 0x1cd   : > { %655 = vmatpush.msrb.mxu0 %v504_v20  ;;  %675 = vmatpush.msrb.mxu1 %v503_v21 }
 0x1cf   : > { %656 = vmatpush.msrb.mxu0 %v492_v23  ;;  %676 = vmatpush.msrb.mxu1 %v491_v24 }
 0x1d0   : > { %756 = vmatmul.msk.f32.vlgmr.msrb.gmra.mxu0 %vm407_vm8, %v584_v14  ;;  %757 = vmatmul.msk.f32.vlgmr.msrb.gmra.mxu1 %vm407_vm8, %v584_v14 }
 0x1d1   : > { %v616_v25 = vpop.permute.xlu0 %615 }
 0x24b   : > { %v638_v26 = vpop.f32.mrf.mxu3 }
 0x24c   : > { %v639_v27 = vadd.f32 %v638_v26, %v616_v25 }
 0x24d   : > { %v658_v28 = vpop.f32.mrf.mxu0  ;;  %v678_v29 = vpop.f32.mrf.mxu1 }
 0x24e   : > { %v684_v30 = vadd.f32 %v639_v27, %v928_v0  ;;  %v659_v9 = vadd.f32 %v658_v28, %v616_v25  ;;  %v679_v31 = vadd.f32 %v678_v29, %v616_v25 }
 0x250   : > { %687 = vst [vmem:[%s251_s26] sm:$0xff] %v684_v30  ;;  %v685_v32 = vadd.f32 %v659_v9, %v930_v1  ;;  %v686_v33 = vadd.f32 %v679_v31, %v940_v5 }
 0x252   : > { %688 = vst [vmem:[%s251_s26 + $0x8] sm:$0xff] %v685_v32 }
 0x253   : > { %689 = vst [vmem:[%s251_s26 + $0x10] sm:$0xff] %v686_v33 }
 0x254 PF: > { %s16_s21 = sadd.s32 1, %s866_s21  }
 0x255   : > { %p13_p4 = scmp.ge.s32.totalorder %s16_s21, 4  }
 0x257   :  { %15 = sbr.rel (!%p13_p4) target bundleno = 1 (0x1), region = 74 }

</bundles_post_ra>
